<compile_context>
chip_gen: v6e
topology: v6e:2x2x1
jax: 0.10.0
libtpu: 0.0.40
codegen_flags: <defaults>
</compile_context>

<pallas_src>
import functools

import numpy as np
import jax
import jax.numpy as jnp
from jax import lax
from jax.experimental import pallas as pl
from jax.experimental.pallas import tpu as pltpu


def _round_up(x, m):
    return (x + m - 1) // m * m


def _residual_block_kernel(x_ref, w1_ref, b1_ref, w2_ref, b2_ref, mask_ref,
                           o_ref, stack_ref, *, wp, l_mid, l_out):
    """conv3x3 -> ReLU -> conv3x3 -> +residual on lane-flattened images.

    x_ref    : (NC, Lx)        rows = (image, channel); each row is the padded
                               image flattened row-major with pitch wp = W+4.
    w*_ref   : (NC, 9*NC)      fused-K block-diagonal channel-mixing weights.
    b*_ref   : (NC, 1)
    mask_ref : (1, l_mid)      1.0 where a mid column is a real conv1 output.
    o_ref    : (NC, l_out)     column p*wp + q holds output pixel (p, q).
    stack_ref: (9*NC, l_mid)   im2col scratch, reused by both convs.
    """
    nc = x_ref.shape[0]
    x = x_ref[...]                                        # (NC, Lx) one wide load

    # ---- conv1: build the 9-tap im2col stack once (sublane-aligned writes) ----
    for tap in range(9):
        s0 = (tap // 3) * wp + (tap % 3)                  # static lane offset
        stack_ref[tap * nc:(tap + 1) * nc, :] = x[:, s0:s0 + l_mid]

    # One fused MXU dot per conv: K = 9*NC = 72 (was 9 separate K=8 dots).
    v1 = jnp.dot(w1_ref[...], stack_ref[...], preferred_element_type=jnp.float32)
    mid = jnp.maximum(v1 + b1_ref[...], 0.0) * mask_ref[...]      # (NC, l_mid)

    # ---- conv2: rebuild the stack from mid (same scratch, first l_out lanes) ----
    for tap in range(9):
        s0 = (tap // 3) * wp + (tap % 3)
        stack_ref[tap * nc:(tap + 1) * nc, :l_out] = mid[:, s0:s0 + l_out]

    res = x[:, 2 * wp + 2:2 * wp + 2 + l_out]             # residual, same flat frame
    out = (jnp.dot(w2_ref[...], stack_ref[:, :l_out],
                   preferred_element_type=jnp.float32)
           + b2_ref[...] + res)
    o_ref[...] = out.astype(o_ref.dtype)                  # unmasked lane-dense store


def pack_params(w1, b1, w2, b2, batch):
    """Build fused-K packed weights / tiled biases ONCE (hoisted off the hot path)."""
    f32 = jnp.float32
    c = b1.shape[0]
    eye = jnp.eye(batch, dtype=f32)

    def pack(w_oihw):
        # (O, I, 3, 3) -> (NC, 9*NC): per-tap block-diagonal channel mixer.
        wt = jnp.transpose(w_oihw.astype(f32), (2, 3, 0, 1)).reshape(9, c, c)  # [t,o,i]
        full = jnp.einsum('nm,toi->notmi', eye, wt)        # (N, C_o, 9, N, C_i)
        return full.reshape(batch * c, 9 * batch * c)

    def tile_b(b):
        return jnp.tile(b.astype(f32), batch).reshape(batch * c, 1)

    return pack(w1), tile_b(b1), pack(w2), tile_b(b2)


@jax.jit
def residual_block(x_nchw, w1p, b1p, w2p, b2p):
    """Pallas TPU forward of ResidualBlock. NCHW in -> NCHW out (PyTorch semantics)."""
    n, c, h, w = x_nchw.shape
    nc = n * c
    f32 = jnp.float32
    wp = w + 4                                   # flattened row pitch
    halo = 2 * wp + 2                            # combined 5x5 receptive-field margin
    l_out = _round_up(h * wp, 128)               # output slab width (covers all pixels)
    l_mid = _round_up(halo + l_out, 128)         # conv1 output slab width
    rows = max(-(-(halo + l_mid) // wp), h + 4)  # padded rows; >= h+4 keeps halo zeros
    pad_bottom = rows - 2 - h

    # ONE fused pad: 2-pixel conv halo + all flat-lane margins in a single HBM copy.
    xflat = jnp.pad(x_nchw.astype(f32),
                    ((0, 0), (0, 0), (2, pad_bottom), (2, 2))).reshape(nc, rows * wp)

    # Validity mask over mid columns: baked numpy constant (zero per-call ops).
    col = np.arange(l_mid)
    rr, cc = col // wp, col % wp
    mask = jnp.asarray(((rr >= 1) & (rr <= h) & (cc >= 1) & (cc <= w))
                       .astype(np.float32)[None, :])

    vmem = pl.BlockSpec(memory_space=pltpu.MemorySpace.VMEM)
    out_flat = pl.pallas_call(
        functools.partial(_residual_block_kernel, wp=wp, l_mid=l_mid, l_out=l_out),
        out_shape=jax.ShapeDtypeStruct((nc, l_out), f32),
        in_specs=[vmem] * 6,
        out_specs=vmem,
        scratch_shapes=[pltpu.VMEM((9 * nc, l_mid), f32)],
    )(xflat, w1p, b1p, w2p, b2p, mask)

    # Output column p*wp + q holds pixel (p, q); drop the right-pad columns.
    return out_flat[:, :h * wp].reshape(n, c, h, wp)[:, :, :, :w]


if __name__ == "__main__":
    key = jax.random.PRNGKey(0)
    N, C, H, W = 2, 4, 16, 16
    k1, k2, k3, k4, k5 = jax.random.split(key, 5)

    # deterministic synthetic parameters matching nn.Conv2d(C, C, 3, padding=1)
    x = jax.random.normal(k1, (N, C, H, W), jnp.float32)
    w1 = jax.random.normal(k2, (C, C, 3, 3), jnp.float32) * 0.1
    b1 = jax.random.normal(k3, (C,), jnp.float32) * 0.1
    w2 = jax.random.normal(k4, (C, C, 3, 3), jnp.float32) * 0.1
    b2 = jax.random.normal(k5, (C,), jnp.float32) * 0.1

    params = pack_params(w1, b1, w2, b2, N)          # hoisted: runs once, not per call
    out = jax.block_until_ready(residual_block(x, *params))

    # pure-JAX reference (same semantics as the PyTorch module)
    def conv(a, wgt, bias):
        y = lax.conv_general_dilated(
            a, wgt, window_strides=(1, 1), padding=((1, 1), (1, 1)),
            dimension_numbers=("NCHW", "OIHW", "NCHW"),
            precision=lax.Precision.HIGHEST)
        return y + bias[None, :, None, None]

    ref = conv(jax.nn.relu(conv(x, w1, b1)), w2, b2) + x
    err = float(jnp.max(jnp.abs(out - ref)))
    assert out.shape == (N, C, H, W) and out.dtype == jnp.float32
    assert jnp.allclose(out, ref, atol=2e-3, rtol=2e-3), f"max abs err {err}"
    print("KERNEL_OK")
</pallas_src>

<mosaic_0001>
module attributes {stable_mosaic.version = 11 : i64} {
  func.func @_residual_block_kernel(%arg0: memref<8x560xf32, #tpu.memory_space<vmem>>, %arg1: memref<8x72xf32, #tpu.memory_space<vmem>>, %arg2: memref<8x1xf32, #tpu.memory_space<vmem>>, %arg3: memref<8x72xf32, #tpu.memory_space<vmem>>, %arg4: memref<8x1xf32, #tpu.memory_space<vmem>>, %arg5: memref<1x512xf32, #tpu.memory_space<vmem>>, %arg6: memref<8x384xf32, #tpu.memory_space<vmem>>, %arg7: memref<72x512xf32, #tpu.memory_space<vmem>>) attributes {dimension_semantics = [], scalar_prefetch = 0 : i64, scratch_operands = 1 : i64, tpu.core_type = #tpu.core_type<tc>} {
    %c0 = arith.constant 0 : index
    %c0_0 = arith.constant 0 : index
    %0 = vector.load %arg0[%c0, %c0_0] : memref<8x560xf32, #tpu.memory_space<vmem>>, vector<8x560xf32>
    %1 = vector.extract_strided_slice %0 {offsets = [0, 0], sizes = [8, 512], strides = [1, 1]} : vector<8x560xf32> to vector<8x512xf32>
    %c0_1 = arith.constant 0 : index
    %c0_2 = arith.constant 0 : index
    %2 = vector.load %arg7[%c0_1, %c0_2] : memref<72x512xf32, #tpu.memory_space<vmem>>, vector<8x512xf32>
    tpu.vector_store %arg7[%c0_1, %c0_2], %1 {strides = array<i32>} : memref<72x512xf32, #tpu.memory_space<vmem>>, vector<8x512xf32>,
    %3 = vector.extract_strided_slice %0 {offsets = [0, 1], sizes = [8, 512], strides = [1, 1]} : vector<8x560xf32> to vector<8x512xf32>
    %c8 = arith.constant 8 : index
    %c0_3 = arith.constant 0 : index
    %4 = vector.load %arg7[%c8, %c0_3] : memref<72x512xf32, #tpu.memory_space<vmem>>, vector<8x512xf32>
    tpu.vector_store %arg7[%c8, %c0_3], %3 {strides = array<i32>} : memref<72x512xf32, #tpu.memory_space<vmem>>, vector<8x512xf32>,
    %5 = vector.extract_strided_slice %0 {offsets = [0, 2], sizes = [8, 512], strides = [1, 1]} : vector<8x560xf32> to vector<8x512xf32>
    %c16 = arith.constant 16 : index
    %c0_4 = arith.constant 0 : index
    %6 = vector.load %arg7[%c16, %c0_4] : memref<72x512xf32, #tpu.memory_space<vmem>>, vector<8x512xf32>
    tpu.vector_store %arg7[%c16, %c0_4], %5 {strides = array<i32>} : memref<72x512xf32, #tpu.memory_space<vmem>>, vector<8x512xf32>,
    %7 = vector.extract_strided_slice %0 {offsets = [0, 20], sizes = [8, 512], strides = [1, 1]} : vector<8x560xf32> to vector<8x512xf32>
    %c24 = arith.constant 24 : index
    %c0_5 = arith.constant 0 : index
    %8 = vector.load %arg7[%c24, %c0_5] : memref<72x512xf32, #tpu.memory_space<vmem>>, vector<8x512xf32>
    tpu.vector_store %arg7[%c24, %c0_5], %7 {strides = array<i32>} : memref<72x512xf32, #tpu.memory_space<vmem>>, vector<8x512xf32>,
    %9 = vector.extract_strided_slice %0 {offsets = [0, 21], sizes = [8, 512], strides = [1, 1]} : vector<8x560xf32> to vector<8x512xf32>
    %c32 = arith.constant 32 : index
    %c0_6 = arith.constant 0 : index
    %10 = vector.load %arg7[%c32, %c0_6] : memref<72x512xf32, #tpu.memory_space<vmem>>, vector<8x512xf32>
    tpu.vector_store %arg7[%c32, %c0_6], %9 {strides = array<i32>} : memref<72x512xf32, #tpu.memory_space<vmem>>, vector<8x512xf32>,
    %11 = vector.extract_strided_slice %0 {offsets = [0, 22], sizes = [8, 512], strides = [1, 1]} : vector<8x560xf32> to vector<8x512xf32>
    %c40 = arith.constant 40 : index
    %c0_7 = arith.constant 0 : index
    %12 = vector.load %arg7[%c40, %c0_7] : memref<72x512xf32, #tpu.memory_space<vmem>>, vector<8x512xf32>
    tpu.vector_store %arg7[%c40, %c0_7], %11 {strides = array<i32>} : memref<72x512xf32, #tpu.memory_space<vmem>>, vector<8x512xf32>,
    %13 = vector.extract_strided_slice %0 {offsets = [0, 40], sizes = [8, 512], strides = [1, 1]} : vector<8x560xf32> to vector<8x512xf32>
    %c48 = arith.constant 48 : index
    %c0_8 = arith.constant 0 : index
    %14 = vector.load %arg7[%c48, %c0_8] : memref<72x512xf32, #tpu.memory_space<vmem>>, vector<8x512xf32>
    tpu.vector_store %arg7[%c48, %c0_8], %13 {strides = array<i32>} : memref<72x512xf32, #tpu.memory_space<vmem>>, vector<8x512xf32>,
    %15 = vector.extract_strided_slice %0 {offsets = [0, 41], sizes = [8, 512], strides = [1, 1]} : vector<8x560xf32> to vector<8x512xf32>
    %c56 = arith.constant 56 : index
    %c0_9 = arith.constant 0 : index
    %16 = vector.load %arg7[%c56, %c0_9] : memref<72x512xf32, #tpu.memory_space<vmem>>, vector<8x512xf32>
    tpu.vector_store %arg7[%c56, %c0_9], %15 {strides = array<i32>} : memref<72x512xf32, #tpu.memory_space<vmem>>, vector<8x512xf32>,
    %17 = vector.extract_strided_slice %0 {offsets = [0, 42], sizes = [8, 512], strides = [1, 1]} : vector<8x560xf32> to vector<8x512xf32>
    %c64 = arith.constant 64 : index
    %c0_10 = arith.constant 0 : index
    %18 = vector.load %arg7[%c64, %c0_10] : memref<72x512xf32, #tpu.memory_space<vmem>>, vector<8x512xf32>
    tpu.vector_store %arg7[%c64, %c0_10], %17 {strides = array<i32>} : memref<72x512xf32, #tpu.memory_space<vmem>>, vector<8x512xf32>,
    %c0_11 = arith.constant 0 : index
    %c0_12 = arith.constant 0 : index
    %19 = vector.load %arg1[%c0_11, %c0_12] : memref<8x72xf32, #tpu.memory_space<vmem>>, vector<8x72xf32>
    %c0_13 = arith.constant 0 : index
    %c0_14 = arith.constant 0 : index
    %20 = vector.load %arg7[%c0_13, %c0_14] : memref<72x512xf32, #tpu.memory_space<vmem>>, vector<72x512xf32>
    %cst = arith.constant dense<0.000000e+00> : vector<8x512xf32>
    %21 = tpu.matmul %19, %20, %cst {dimension_numbers = #tpu.dot_dimension_numbers<[1], [0], [0], [1], [0, 0, 1, 1], [], []>} : vector<8x72xf32>, vector<72x512xf32>, vector<8x512xf32> -> vector<8x512xf32>
    %c0_15 = arith.constant 0 : index
    %c0_16 = arith.constant 0 : index
    %22 = vector.load %arg2[%c0_15, %c0_16] : memref<8x1xf32, #tpu.memory_space<vmem>>, vector<8x1xf32>
    %23 = vector.broadcast %22 : vector<8x1xf32> to vector<8x512xf32>
    %24 = arith.addf %21, %23 : vector<8x512xf32>
    %cst_17 = arith.constant 0.000000e+00 : f32
    %25 = vector.broadcast %cst_17 : f32 to vector<8x512xf32>
    %26 = arith.maximumf %24, %25 : vector<8x512xf32>
    %c0_18 = arith.constant 0 : index
    %c0_19 = arith.constant 0 : index
    %27 = vector.load %arg5[%c0_18, %c0_19] : memref<1x512xf32, #tpu.memory_space<vmem>>, vector<1x512xf32>
    %28 = vector.broadcast %27 : vector<1x512xf32> to vector<8x512xf32>
    %29 = arith.mulf %26, %28 : vector<8x512xf32>
    %30 = vector.extract_strided_slice %29 {offsets = [0, 0], sizes = [8, 384], strides = [1, 1]} : vector<8x512xf32> to vector<8x384xf32>
    %c0_20 = arith.constant 0 : index
    %c0_21 = arith.constant 0 : index
    %31 = vector.load %arg7[%c0_20, %c0_21] : memref<72x512xf32, #tpu.memory_space<vmem>>, vector<8x384xf32>
    tpu.vector_store %arg7[%c0_20, %c0_21], %30 {strides = array<i32>} : memref<72x512xf32, #tpu.memory_space<vmem>>, vector<8x384xf32>,
    %32 = vector.extract_strided_slice %29 {offsets = [0, 1], sizes = [8, 384], strides = [1, 1]} : vector<8x512xf32> to vector<8x384xf32>
    %c8_22 = arith.constant 8 : index
    %c0_23 = arith.constant 0 : index
    %33 = vector.load %arg7[%c8_22, %c0_23] : memref<72x512xf32, #tpu.memory_space<vmem>>, vector<8x384xf32>
    tpu.vector_store %arg7[%c8_22, %c0_23], %32 {strides = array<i32>} : memref<72x512xf32, #tpu.memory_space<vmem>>, vector<8x384xf32>,
    %34 = vector.extract_strided_slice %29 {offsets = [0, 2], sizes = [8, 384], strides = [1, 1]} : vector<8x512xf32> to vector<8x384xf32>
    %c16_24 = arith.constant 16 : index
    %c0_25 = arith.constant 0 : index
    %35 = vector.load %arg7[%c16_24, %c0_25] : memref<72x512xf32, #tpu.memory_space<vmem>>, vector<8x384xf32>
    tpu.vector_store %arg7[%c16_24, %c0_25], %34 {strides = array<i32>} : memref<72x512xf32, #tpu.memory_space<vmem>>, vector<8x384xf32>,
    %36 = vector.extract_strided_slice %29 {offsets = [0, 20], sizes = [8, 384], strides = [1, 1]} : vector<8x512xf32> to vector<8x384xf32>
    %c24_26 = arith.constant 24 : index
    %c0_27 = arith.constant 0 : index
    %37 = vector.load %arg7[%c24_26, %c0_27] : memref<72x512xf32, #tpu.memory_space<vmem>>, vector<8x384xf32>
    tpu.vector_store %arg7[%c24_26, %c0_27], %36 {strides = array<i32>} : memref<72x512xf32, #tpu.memory_space<vmem>>, vector<8x384xf32>,
    %38 = vector.extract_strided_slice %29 {offsets = [0, 21], sizes = [8, 384], strides = [1, 1]} : vector<8x512xf32> to vector<8x384xf32>
    %c32_28 = arith.constant 32 : index
    %c0_29 = arith.constant 0 : index
    %39 = vector.load %arg7[%c32_28, %c0_29] : memref<72x512xf32, #tpu.memory_space<vmem>>, vector<8x384xf32>
    tpu.vector_store %arg7[%c32_28, %c0_29], %38 {strides = array<i32>} : memref<72x512xf32, #tpu.memory_space<vmem>>, vector<8x384xf32>,
    %40 = vector.extract_strided_slice %29 {offsets = [0, 22], sizes = [8, 384], strides = [1, 1]} : vector<8x512xf32> to vector<8x384xf32>
    %c40_30 = arith.constant 40 : index
    %c0_31 = arith.constant 0 : index
    %41 = vector.load %arg7[%c40_30, %c0_31] : memref<72x512xf32, #tpu.memory_space<vmem>>, vector<8x384xf32>
    tpu.vector_store %arg7[%c40_30, %c0_31], %40 {strides = array<i32>} : memref<72x512xf32, #tpu.memory_space<vmem>>, vector<8x384xf32>,
    %42 = vector.extract_strided_slice %29 {offsets = [0, 40], sizes = [8, 384], strides = [1, 1]} : vector<8x512xf32> to vector<8x384xf32>
    %c48_32 = arith.constant 48 : index
    %c0_33 = arith.constant 0 : index
    %43 = vector.load %arg7[%c48_32, %c0_33] : memref<72x512xf32, #tpu.memory_space<vmem>>, vector<8x384xf32>
    tpu.vector_store %arg7[%c48_32, %c0_33], %42 {strides = array<i32>} : memref<72x512xf32, #tpu.memory_space<vmem>>, vector<8x384xf32>,
    %44 = vector.extract_strided_slice %29 {offsets = [0, 41], sizes = [8, 384], strides = [1, 1]} : vector<8x512xf32> to vector<8x384xf32>
    %c56_34 = arith.constant 56 : index
    %c0_35 = arith.constant 0 : index
    %45 = vector.load %arg7[%c56_34, %c0_35] : memref<72x512xf32, #tpu.memory_space<vmem>>, vector<8x384xf32>
    tpu.vector_store %arg7[%c56_34, %c0_35], %44 {strides = array<i32>} : memref<72x512xf32, #tpu.memory_space<vmem>>, vector<8x384xf32>,
    %46 = vector.extract_strided_slice %29 {offsets = [0, 42], sizes = [8, 384], strides = [1, 1]} : vector<8x512xf32> to vector<8x384xf32>
    %c64_36 = arith.constant 64 : index
    %c0_37 = arith.constant 0 : index
    %47 = vector.load %arg7[%c64_36, %c0_37] : memref<72x512xf32, #tpu.memory_space<vmem>>, vector<8x384xf32>
    tpu.vector_store %arg7[%c64_36, %c0_37], %46 {strides = array<i32>} : memref<72x512xf32, #tpu.memory_space<vmem>>, vector<8x384xf32>,
    %48 = vector.extract_strided_slice %0 {offsets = [0, 42], sizes = [8, 384], strides = [1, 1]} : vector<8x560xf32> to vector<8x384xf32>
    %c0_38 = arith.constant 0 : index
    %c0_39 = arith.constant 0 : index
    %49 = vector.load %arg3[%c0_38, %c0_39] : memref<8x72xf32, #tpu.memory_space<vmem>>, vector<8x72xf32>
    %c0_40 = arith.constant 0 : index
    %c0_41 = arith.constant 0 : index
    %50 = vector.load %arg7[%c0_40, %c0_41] : memref<72x512xf32, #tpu.memory_space<vmem>>, vector<72x384xf32>
    %cst_42 = arith.constant dense<0.000000e+00> : vector<8x384xf32>
    %51 = tpu.matmul %49, %50, %cst_42 {dimension_numbers = #tpu.dot_dimension_numbers<[1], [0], [0], [1], [0, 0, 1, 1], [], []>} : vector<8x72xf32>, vector<72x384xf32>, vector<8x384xf32> -> vector<8x384xf32>
    %c0_43 = arith.constant 0 : index
    %c0_44 = arith.constant 0 : index
    %52 = vector.load %arg4[%c0_43, %c0_44] : memref<8x1xf32, #tpu.memory_space<vmem>>, vector<8x1xf32>
    %53 = vector.broadcast %52 : vector<8x1xf32> to vector<8x384xf32>
    %54 = arith.addf %51, %53 : vector<8x384xf32>
    %55 = arith.addf %54, %48 : vector<8x384xf32>
    %c0_45 = arith.constant 0 : index
    %c0_46 = arith.constant 0 : index
    %56 = vector.load %arg6[%c0_45, %c0_46] : memref<8x384xf32, #tpu.memory_space<vmem>>, vector<8x384xf32>
    tpu.vector_store %arg6[%c0_45, %c0_46], %55 {strides = array<i32>} : memref<8x384xf32, #tpu.memory_space<vmem>>, vector<8x384xf32>,
    return
  }
}

</mosaic_0001>

<bundles_post_ra>
// kernel: residual_block.1
= control target key start
LH: loop header
LB: loop body
LE: loop exit
PB: predicated region body
PF: predicated region fallthrough
CT: control target
= control target key end

     0   :  { %s818_s25 = smov 86   ;;  %s819_s28 = smov 87   ;;  %v825_v5 = vmov 0.0   ;;  %v827_v6 = vmov 0   ;;  %vm208_vm0 = vcmask 703488   ;;  %vm185_vm1 = vcmask 711680   ;;  %s1148_s0 = inlined_call_operand.vmem [shape: f32[8,560], index: 0, kind: input, shape index: {}]   ;;  %s1149_s2 = inlined_call_operand.vmem [shape: f32[8,1], index: 2, kind: input, shape index: {}]   ;;  %s1150_s1 = inlined_call_operand.vmem [shape: f32[8,72], index: 1, kind: input, shape index: {}]   ;;  %s1151_s5 = inlined_call_operand.vmem [shape: f32[1,512], index: 5, kind: input, shape index: {}]   ;;  %s1152_s4 = inlined_call_operand.vmem [shape: f32[8,1], index: 4, kind: input, shape index: {}]   ;;  %s1153_s3 = inlined_call_operand.vmem [shape: f32[8,72], index: 3, kind: input, shape index: {}]   ;;  %s1154_s6 = inlined_call_operand.vmem [shape: f32[8,384], index: 6, kind: output, shape index: {}]  }
   0x1   :  { %v867_v0 = vld [vmem:[%s1148_s0 + $0x8] sm:$0xff]  ;;  %v872_v1 = vld [vmem:[%s1148_s0] sm:$0xff]  ;;  %v881_v2 = vld [vmem:[%s1148_s0 + $0x10] sm:$0xff]  ;;  %s820_s9 = smov 88   ;;  %s822_s10 = smov 107   ;;  %332 = vmatprep.mubr.f32.mxu0 %v825_v5  ;;  %403 = vmatprep.mubr.f32.mxu1 %v825_v5  ;;  %vm162_vm2 = vcmask 719872  }
   0x2   :  { %200 = vrot.lane.b32.xlu0 %v867_v0, %s818_s25  ;;  %198 = vrot.lane.b32.xlu1 %v872_v1, %s818_s25  ;;  %v890_v3 = vld [vmem:[%s1148_s0 + $0x18] sm:$0xff]  ;;  %v27_v4 = vld [vmem:[%s1148_s0 + $0x20] sm:$0xff]  ;;  %s821_s0 = smov 106   ;;  %s823_s11 = smov 108   ;;  %vm139_vm3 = vcmask 867328   ;;  %vm116_vm4 = vcmask 875520  }
   0x3   :  { %s824_s12 = smov 126   ;;  %s826_s13 = smov 127   ;;  %817 = vset.pattern.permute.xlu0 %v827_v6  ;;  %v258_v7 = vld [vmem:[%s1149_s2] sm:$0xff]  ;;  %vm93_vm5 = vcmask 883712   ;;  %vm70_vm6 = vcmask 1031168   ;;  %vm47_vm7 = vcmask 1039360  }
   0x4   :  { %vm264_vm8 = vcmask 588800   ;;  %vm828_vm9 = vmmov 0  }
   0x6   :  { %202 = vrot.lane.b32.xlu0 %v881_v2, %s818_s25  ;;  %177 = vrot.lane.b32.xlu1 %v867_v0, %s819_s28 }
   0xa   :  { %179 = vrot.lane.b32.xlu0 %v881_v2, %s819_s28  ;;  %204 = vrot.lane.b32.xlu1 %v890_v3, %s818_s25 }
   0xe   :  { %206 = vrot.lane.b32.xlu0 %v27_v4, %s818_s25  ;;  %175 = vrot.lane.b32.xlu1 %v872_v1, %s819_s28 }
  0x12   :  { %154 = vrot.lane.b32.xlu0 %v867_v0, %s820_s9  ;;  %156 = vrot.lane.b32.xlu1 %v881_v2, %s820_s9 }
  0x16   :  { %181 = vrot.lane.b32.xlu0 %v890_v3, %s819_s28  ;;  %183 = vrot.lane.b32.xlu1 %v27_v4, %s819_s28 }
  0x1a   :  { %152 = vrot.lane.b32.xlu0 %v872_v1, %s820_s9  ;;  %131 = vrot.lane.b32.xlu1 %v867_v0, %s821_s0 }
  0x1e   :  { %133 = vrot.lane.b32.xlu0 %v881_v2, %s821_s0  ;;  %158 = vrot.lane.b32.xlu1 %v890_v3, %s820_s9 }
  0x22   :  { %160 = vrot.lane.b32.xlu0 %v27_v4, %s820_s9  ;;  %129 = vrot.lane.b32.xlu1 %v872_v1, %s821_s0 }
  0x26   :  { %108 = vrot.lane.b32.xlu0 %v867_v0, %s822_s10  ;;  %110 = vrot.lane.b32.xlu1 %v881_v2, %s822_s10 }
  0x2a   :  { %135 = vrot.lane.b32.xlu0 %v890_v3, %s821_s0  ;;  %137 = vrot.lane.b32.xlu1 %v27_v4, %s821_s0 }
  0x2e   :  { %106 = vrot.lane.b32.xlu0 %v872_v1, %s822_s10  ;;  %85 = vrot.lane.b32.xlu1 %v867_v0, %s823_s11 }
  0x32   :  { %87 = vrot.lane.b32.xlu0 %v881_v2, %s823_s11  ;;  %112 = vrot.lane.b32.xlu1 %v890_v3, %s822_s10 }
  0x36   :  { %114 = vrot.lane.b32.xlu0 %v27_v4, %s822_s10  ;;  %83 = vrot.lane.b32.xlu1 %v872_v1, %s823_s11 }
  0x3a   :  { %62 = vrot.lane.b32.xlu0 %v867_v0, %s824_s12  ;;  %64 = vrot.lane.b32.xlu1 %v881_v2, %s824_s12 }
  0x3e   :  { %89 = vrot.lane.b32.xlu0 %v890_v3, %s823_s11  ;;  %91 = vrot.lane.b32.xlu1 %v27_v4, %s823_s11 }
  0x42   :  { %60 = vrot.lane.b32.xlu0 %v872_v1, %s824_s12  ;;  %39 = vrot.lane.b32.xlu1 %v867_v0, %s826_s13 }
  0x46   :  { %41 = vrot.lane.b32.xlu0 %v881_v2, %s826_s13  ;;  %66 = vrot.lane.b32.xlu1 %v890_v3, %s824_s12 }
  0x4a   :  { %68 = vrot.lane.b32.xlu0 %v27_v4, %s824_s12  ;;  %37 = vrot.lane.b32.xlu1 %v872_v1, %s826_s13 }
  0x4e   :  { %43 = vrot.lane.b32.xlu0 %v890_v3, %s826_s13  ;;  %45 = vrot.lane.b32.xlu1 %v27_v4, %s826_s13 }
  0x52   :  { %261 = vperm.xlu0 %817, %v258_v7  }
  0x74   :  { %v201_v8 = vpop.permute.xlu0 %200  ;;  %v199_v9 = vpop.permute.xlu1 %198 }
  0x75   :  { %v969_v13 = vsel %vm208_vm0, %v199_v9, %v201_v8 }
  0x78   :  { %v203_v10 = vpop.permute.xlu0 %202  ;;  %v178_v11 = vpop.permute.xlu1 %177 }
  0x79   :  { %v965_v12 = vsel %vm208_vm0, %v201_v8, %v203_v10 }
  0x7a   :  { %282 = vmatprep.subr.mxu0 %v965_v12 }
  0x7b   :  { %283 = vmatpush1.msra.mxu0 %v969_v13 }
  0x7c   :  { %v180_v14 = vpop.permute.xlu0 %179  ;;  %v205_v15 = vpop.permute.xlu1 %204 }
  0x7d   :  { %v187_v16 = vsel %vm185_vm1, %v178_v11, %v180_v14  ;;  %v976_v21 = vsel %vm208_vm0, %v203_v10, %v205_v15 }
  0x7e   :  { %284 = vmatprep.subr.mxu0 %v187_v16 }
  0x80   :  { %v207_v17 = vpop.permute.xlu0 %206  ;;  %v176_v18 = vpop.permute.xlu1 %175 }
  0x81   :  { %v186_v19 = vsel %vm185_vm1, %v176_v18, %v178_v11  ;;  %v212_v20 = vsel %vm208_vm0, %v205_v15, %v207_v17 }
  0x82   :  { %285 = vmatpush1.msra.mxu0 %v186_v19  ;;  %353 = vmatprep.subr.mxu1 %v212_v20  ;;  %v221_v19 = vld [vmem:[%s1150_s1] sm:$0xff] }
  0x83   :  { %354 = vmatpush1.msra.mxu1 %v976_v21 }
  0x84   :  { %v155_v22 = vpop.permute.xlu0 %154  ;;  %v157_v23 = vpop.permute.xlu1 %156 }
  0x85   :  { %v164_v24 = vsel %vm162_vm2, %v155_v22, %v157_v23 }
  0x86   :  { %286 = vmatprep.subr.mxu0 %v164_v24 }
  0x88   :  { %v182_v25 = vpop.permute.xlu0 %181  ;;  %v184_v26 = vpop.permute.xlu1 %183 }
  0x89   :  { %v189_v27 = vsel %vm185_vm1, %v182_v25, %v184_v26  ;;  %v188_v28 = vsel %vm185_vm1, %v180_v14, %v182_v25 }
  0x8a   :  { %355 = vmatprep.subr.mxu1 %v189_v27  ;;  %v414_v27 = vld [vmem:[%s1151_s5] sm:$0xf] }
  0x8b   :  { %356 = vmatpush1.msra.mxu1 %v188_v28 }
  0x8c   :  { %v153_v29 = vpop.permute.xlu0 %152  ;;  %v132_v30 = vpop.permute.xlu1 %131 }
  0x8d   :  { %v163_v31 = vsel %vm162_vm2, %v153_v29, %v155_v22 }
  0x8e   :  { %287 = vmatpush1.msra.mxu0 %v163_v31 }
  0x90   :  { %v134_v32 = vpop.permute.xlu0 %133  ;;  %v159_v33 = vpop.permute.xlu1 %158 }
  0x91   :  { %v141_v34 = vsel %vm139_vm3, %v132_v30, %v134_v32  ;;  %v165_v39 = vsel %vm162_vm2, %v157_v23, %v159_v33 }
  0x92   :  { %288 = vmatprep.subr.mxu0 %v141_v34 }
  0x94   :  { %v161_v35 = vpop.permute.xlu0 %160  ;;  %v130_v36 = vpop.permute.xlu1 %129 }
  0x95   :  { %v140_v37 = vsel %vm139_vm3, %v130_v36, %v132_v30  ;;  %v166_v38 = vsel %vm162_vm2, %v159_v33, %v161_v35 }
  0x96   :  { %289 = vmatpush1.msra.mxu0 %v140_v37  ;;  %357 = vmatprep.subr.mxu1 %v166_v38 }
  0x97   :  { %358 = vmatpush1.msra.mxu1 %v165_v39 }
  0x98   :  { %v109_v40 = vpop.permute.xlu0 %108  ;;  %v111_v41 = vpop.permute.xlu1 %110 }
  0x99   :  { %v118_v42 = vsel %vm116_vm4, %v109_v40, %v111_v41 }
  0x9a   :  { %290 = vmatprep.subr.mxu0 %v118_v42 }
  0x9c   :  { %v136_v43 = vpop.permute.xlu0 %135  ;;  %v138_v44 = vpop.permute.xlu1 %137 }
  0x9d   :  { %v143_v45 = vsel %vm139_vm3, %v136_v43, %v138_v44  ;;  %v142_v46 = vsel %vm139_vm3, %v134_v32, %v136_v43 }
  0x9e   :  { %359 = vmatprep.subr.mxu1 %v143_v45 }
  0x9f   :  { %360 = vmatpush1.msra.mxu1 %v142_v46 }
  0xa0   :  { %v107_v47 = vpop.permute.xlu0 %106  ;;  %v86_v48 = vpop.permute.xlu1 %85 }
  0xa1   :  { %v117_v49 = vsel %vm116_vm4, %v107_v47, %v109_v40 }
  0xa2   :  { %291 = vmatpush1.msra.mxu0 %v117_v49  ;;  %v611_v49 = vld [vmem:[%s1152_s4] sm:$0xff] }
  0xa4   :  { %v88_v50 = vpop.permute.xlu0 %87  ;;  %v113_v51 = vpop.permute.xlu1 %112 }
  0xa5   :  { %v95_v52 = vsel %vm93_vm5, %v86_v48, %v88_v50  ;;  %v119_v57 = vsel %vm116_vm4, %v111_v41, %v113_v51 }
  0xa6   :  { %292 = vmatprep.subr.mxu0 %v95_v52 }
  0xa8   :  { %v115_v53 = vpop.permute.xlu0 %114  ;;  %v84_v54 = vpop.permute.xlu1 %83 }
  0xa9   :  { %v94_v55 = vsel %vm93_vm5, %v84_v54, %v86_v48  ;;  %v120_v56 = vsel %vm116_vm4, %v113_v51, %v115_v53 }
  0xaa   :  { %293 = vmatpush1.msra.mxu0 %v94_v55  ;;  %361 = vmatprep.subr.mxu1 %v120_v56 }
  0xab   :  { %362 = vmatpush1.msra.mxu1 %v119_v57 }
  0xac   :  { %v63_v58 = vpop.permute.xlu0 %62  ;;  %v65_v59 = vpop.permute.xlu1 %64 }
  0xad   :  { %v72_v60 = vsel %vm70_vm6, %v63_v58, %v65_v59 }
  0xae   :  { %294 = vmatprep.subr.mxu0 %v72_v60 }
  0xb0   :  { %v90_v61 = vpop.permute.xlu0 %89  ;;  %v92_v62 = vpop.permute.xlu1 %91 }
  0xb1   :  { %v97_v63 = vsel %vm93_vm5, %v90_v61, %v92_v62  ;;  %v96_v4 = vsel %vm93_vm5, %v88_v50, %v90_v61 }
  0xb2   :  { %363 = vmatprep.subr.mxu1 %v97_v63 }
  0xb3   :  { %364 = vmatpush1.msra.mxu1 %v96_v4 }
  0xb4   :  { %v61_v6 = vpop.permute.xlu0 %60  ;;  %v40_v7 = vpop.permute.xlu1 %39 }
  0xb5   :  { %v71_v8 = vsel %vm70_vm6, %v61_v6, %v63_v58 }
  0xb6   :  { %295 = vmatpush1.msra.mxu0 %v71_v8 }
  0xb8   :  { %v42_v9 = vpop.permute.xlu0 %41  ;;  %v67_v10 = vpop.permute.xlu1 %66 }
  0xb9   :  { %v49_v11 = vsel %vm47_vm7, %v40_v7, %v42_v9  ;;  %v73_v18 = vsel %vm70_vm6, %v65_v59, %v67_v10 }
  0xba   :  { %296 = vmatprep.subr.mxu0 %v49_v11 }
  0xbc   :  { %v69_v14 = vpop.permute.xlu0 %68  ;;  %v38_v15 = vpop.permute.xlu1 %37 }
  0xbd   :  { %v48_v16 = vsel %vm47_vm7, %v38_v15, %v40_v7  ;;  %v74_v17 = vsel %vm70_vm6, %v67_v10, %v69_v14 }
  0xbe   :  { %297 = vmatpush1.msra.mxu0 %v48_v16  ;;  %365 = vmatprep.subr.mxu1 %v74_v17 }
  0xbf   :  { %366 = vmatpush1.msra.mxu1 %v73_v18  ;;  %298 = vmatprep.subr.mxu0 %v867_v0  ;;  %v416_v0 = vlaneseq }
  0xc0   :  { %v44_v20 = vpop.permute.xlu0 %43  ;;  %v46_v22 = vpop.permute.xlu1 %45  ;;  %299 = vmatpush1.msra.mxu0 %v872_v1 }
  0xc1   :  { %771 = vmatmul.mubr.msk.f32.vlgmr.msra.gmra.mxu0 %vm264_vm8, %v221_v19  ;;  %v51_v23 = vsel %vm47_vm7, %v44_v20, %v46_v22  ;;  %v50_v24 = vsel %vm47_vm7, %v42_v9, %v44_v20  ;;  %v417_v1 = vshrl.u32 %v416_v0, 7 }
  0xc2   :  { %367 = vmatprep.subr.mxu1 %v51_v23  ;;  %684 = vmatprep.mubr.f32.mxu0 %v825_v5 }
  0xc3   :  { %368 = vmatpush1.msra.mxu1 %v50_v24  ;;  %v418_v25 = vsub.s32 0, %v417_v1  ;;  %v426_v31 = vsub.s32 2, %v417_v1  ;;  %v430_v39 = vsub.s32 3, %v417_v1  ;;  %v422_v42 = vsub.s32 1, %v417_v1 }
  0xc4   :  { %369 = vmatprep.subr.mxu1 %v890_v3 }
  0xc5   :  { %370 = vmatpush1.msra.mxu1 %v881_v2  ;;  %v419_v30 = vrot.slane %v414_v27, %v418_v25  ;;  %v427_v34 = vrot.slane %v414_v27, %v426_v31  ;;  %v431_v44 = vrot.slane %v414_v27, %v430_v39  ;;  %v423_v46 = vrot.slane %v414_v27, %v422_v42 }
  0xc6   :  { %772 = vmatmul.mubr.msk.f32.vlgmr.msra.gmra.mxu1 %vm264_vm8, %v221_v19  ;;  %785 = vmatprep.subr.mxu1 %v825_v5 }
  0xc7   :  { %803 = vmatprep.mubr.msk.f32.mxu1 %vm828_vm9, %v825_v5 }
  0xcd   :  { %v262_v26 = vpop.permute.xlu0 %261 }
 0x181   :  { %v334_v28 = vpop.f32.mrf.mxu0 }
 0x182   :  { %v335_v29 = vadd.f32 %v334_v28, %v262_v26 }
 0x183   :  { %v336_v40 = vpop.f32.mrf.mxu0 }
 0x184   :  { %v410_v32 = vmax.f32 %v335_v29, 0.0  ;;  %v337_v41 = vadd.f32 %v336_v40, %v262_v26 }
 0x186   :  { %v1019_v3 = vmul.f32 %v419_v30, %v410_v32  ;;  %v405_v2 = vpop.f32.mrf.mxu1  ;;  %v411_v45 = vmax.f32 %v337_v41, 0.0 }
 0x187   :  { %v406_v33 = vadd.f32 %v405_v2, %v262_v26 }
 0x188   :  { %566 = vrot.lane.b32.xlu0 %v1019_v3, %s818_s25  ;;  %v407_v37 = vpop.f32.mrf.mxu1  ;;  %v1056_v48 = vmul.f32 %v423_v46, %v411_v45  ;;  %v583_v46 = vld [vmem:[%s1153_s3] sm:$0xff] }
 0x189   :  { %v412_v35 = vmax.f32 %v406_v33, 0.0  ;;  %v408_v38 = vadd.f32 %v407_v37, %v262_v26 }
 0x18b   :  { %v1023_v36 = vmul.f32 %v427_v34, %v412_v35  ;;  %v413_v43 = vmax.f32 %v408_v38, 0.0 }
 0x18d   :  { %553 = vrot.lane.b32.xlu0 %v1023_v36, %s819_s28  ;;  %570 = vrot.lane.b32.xlu1 %v1023_v36, %s818_s25  ;;  %v439_v47 = vmul.f32 %v431_v44, %v413_v43 }
 0x191   :  { %536 = vrot.lane.b32.xlu0 %v1023_v36, %s820_s9  ;;  %549 = vrot.lane.b32.xlu1 %v1019_v3, %s819_s28 }
 0x195   :  { %519 = vrot.lane.b32.xlu0 %v1023_v36, %s821_s0  ;;  %532 = vrot.lane.b32.xlu1 %v1019_v3, %s820_s9 }
 0x199   :  { %502 = vrot.lane.b32.xlu0 %v1023_v36, %s822_s10  ;;  %515 = vrot.lane.b32.xlu1 %v1019_v3, %s821_s0 }
 0x19d   :  { %485 = vrot.lane.b32.xlu0 %v1023_v36, %s823_s11  ;;  %498 = vrot.lane.b32.xlu1 %v1019_v3, %s822_s10 }
 0x1a1   :  { %468 = vrot.lane.b32.xlu0 %v1023_v36, %s824_s12  ;;  %481 = vrot.lane.b32.xlu1 %v1019_v3, %s823_s11 }
 0x1a5   :  { %451 = vrot.lane.b32.xlu0 %v1023_v36, %s826_s13  ;;  %464 = vrot.lane.b32.xlu1 %v1019_v3, %s824_s12 }
 0x1a9   :  { %572 = vrot.lane.b32.xlu0 %v439_v47, %s818_s25  ;;  %447 = vrot.lane.b32.xlu1 %v1019_v3, %s826_s13 }
 0x1ad   :  { %555 = vrot.lane.b32.xlu0 %v439_v47, %s819_s28  ;;  %568 = vrot.lane.b32.xlu1 %v1056_v48, %s818_s25 }
 0x1b1   :  { %538 = vrot.lane.b32.xlu0 %v439_v47, %s820_s9  ;;  %551 = vrot.lane.b32.xlu1 %v1056_v48, %s819_s28 }
 0x1b5   :  { %521 = vrot.lane.b32.xlu0 %v439_v47, %s821_s0  ;;  %534 = vrot.lane.b32.xlu1 %v1056_v48, %s820_s9 }
 0x1b9   :  { %504 = vrot.lane.b32.xlu0 %v439_v47, %s822_s10  ;;  %517 = vrot.lane.b32.xlu1 %v1056_v48, %s821_s0 }
 0x1bd   :  { %487 = vrot.lane.b32.xlu0 %v439_v47, %s823_s11  ;;  %500 = vrot.lane.b32.xlu1 %v1056_v48, %s822_s10 }
 0x1c1   :  { %470 = vrot.lane.b32.xlu0 %v439_v47, %s824_s12  ;;  %483 = vrot.lane.b32.xlu1 %v1056_v48, %s823_s11 }
 0x1c5   :  { %614 = vperm.xlu0 %817, %v611_v49   ;;  %466 = vrot.lane.b32.xlu1 %v1056_v48, %s824_s12 }
 0x1c9   :  { %449 = vrot.lane.b32.xlu1 %v1056_v48, %s826_s13 }
 0x1cd   :  { %453 = vrot.lane.b32.xlu1 %v439_v47, %s826_s13 }
 0x1fa   :  { %v567_v50 = vpop.permute.xlu0 %566 }
 0x1ff   :  { %v554_v51 = vpop.permute.xlu0 %553  ;;  %v571_v52 = vpop.permute.xlu1 %570 }
 0x203   :  { %v537_v53 = vpop.permute.xlu0 %536  ;;  %v550_v54 = vpop.permute.xlu1 %549 }
 0x207   :  { %v520_v55 = vpop.permute.xlu0 %519  ;;  %v533_v56 = vpop.permute.xlu1 %532 }
 0x20b   :  { %v503_v57 = vpop.permute.xlu0 %502  ;;  %v516_v58 = vpop.permute.xlu1 %515 }
 0x20f   :  { %v486_v59 = vpop.permute.xlu0 %485  ;;  %v499_v60 = vpop.permute.xlu1 %498 }
 0x213   :  { %v1085_v61 = vpop.permute.xlu0 %468  ;;  %v482_v62 = vpop.permute.xlu1 %481 }
 0x217   :  { %v1087_v63 = vpop.permute.xlu0 %451  ;;  %v465_v4 = vpop.permute.xlu1 %464 }
 0x21b   :  { %v573_v6 = vpop.permute.xlu0 %572  ;;  %v1089_v7 = vpop.permute.xlu1 %447 }
 0x21c   :  { %v576_v8 = vsel %vm208_vm0, %v571_v52, %v573_v6 }
 0x21d   :  { %786 = vmatpush3.msra.mxu1 %v576_v8 }
 0x21e   :  { %787 = vmatprep.subr.mxu1 %v825_v5 }
 0x21f   :  { %v556_v9 = vpop.permute.xlu0 %555  ;;  %v569_v10 = vpop.permute.xlu1 %568 }
 0x220   :  { %v559_v11 = vsel %vm185_vm1, %v554_v51, %v556_v9  ;;  %v574_v14 = vsel %vm208_vm0, %v567_v50, %v569_v10  ;;  %v575_v15 = vsel %vm208_vm0, %v569_v10, %v571_v52 }
 0x221   :  { %634 = vmatprep.subr.mxu0 %v575_v15  ;;  %788 = vmatpush3.msra.mxu1 %v559_v11 }
 0x222   :  { %635 = vmatpush1.msra.mxu0 %v574_v14  ;;  %789 = vmatprep.subr.mxu1 %v825_v5 }
 0x223   :  { %v539_v16 = vpop.permute.xlu0 %538  ;;  %v552_v17 = vpop.permute.xlu1 %551 }
 0x224   :  { %v542_v18 = vsel %vm162_vm2, %v537_v53, %v539_v16  ;;  %v557_v19 = vsel %vm185_vm1, %v550_v54, %v552_v17  ;;  %v558_v20 = vsel %vm185_vm1, %v552_v17, %v554_v51 }
 0x225   :  { %636 = vmatprep.subr.mxu0 %v558_v20  ;;  %790 = vmatpush3.msra.mxu1 %v542_v18 }
 0x226   :  { %637 = vmatpush1.msra.mxu0 %v557_v19  ;;  %791 = vmatprep.subr.mxu1 %v825_v5 }
 0x227   :  { %v522_v22 = vpop.permute.xlu0 %521  ;;  %v535_v23 = vpop.permute.xlu1 %534 }
 0x228   :  { %v525_v24 = vsel %vm139_vm3, %v520_v55, %v522_v22  ;;  %v540_v0 = vsel %vm162_vm2, %v533_v56, %v535_v23  ;;  %v541_v1 = vsel %vm162_vm2, %v535_v23, %v537_v53 }
 0x229   :  { %638 = vmatprep.subr.mxu0 %v541_v1  ;;  %792 = vmatpush3.msra.mxu1 %v525_v24 }
 0x22a   :  { %639 = vmatpush1.msra.mxu0 %v540_v0  ;;  %793 = vmatprep.subr.mxu1 %v825_v5 }
 0x22b   :  { %v505_v25 = vpop.permute.xlu0 %504  ;;  %v518_v26 = vpop.permute.xlu1 %517 }
 0x22c   :  { %v508_v27 = vsel %vm116_vm4, %v503_v57, %v505_v25  ;;  %v523_v28 = vsel %vm139_vm3, %v516_v58, %v518_v26  ;;  %v524_v29 = vsel %vm139_vm3, %v518_v26, %v520_v55 }
 0x22d   :  { %640 = vmatprep.subr.mxu0 %v524_v29  ;;  %794 = vmatpush3.msra.mxu1 %v508_v27 }
 0x22e   :  { %641 = vmatpush1.msra.mxu0 %v523_v28  ;;  %795 = vmatprep.subr.mxu1 %v825_v5 }
 0x22f   :  { %v488_v30 = vpop.permute.xlu0 %487  ;;  %v501_v31 = vpop.permute.xlu1 %500 }
 0x230   :  { %v491_v32 = vsel %vm93_vm5, %v486_v59, %v488_v30  ;;  %v506_v2 = vsel %vm116_vm4, %v499_v60, %v501_v31  ;;  %v507_v33 = vsel %vm116_vm4, %v501_v31, %v503_v57 }
 0x231   :  { %642 = vmatprep.subr.mxu0 %v507_v33  ;;  %796 = vmatpush3.msra.mxu1 %v491_v32 }
 0x232   :  { %643 = vmatpush1.msra.mxu0 %v506_v2  ;;  %797 = vmatprep.subr.mxu1 %v825_v5 }
 0x233   :  { %v471_v34 = vpop.permute.xlu0 %470  ;;  %v484_v35 = vpop.permute.xlu1 %483 }
 0x234   :  { %v474_v37 = vsel %vm70_vm6, %v1085_v61, %v471_v34  ;;  %v489_v38 = vsel %vm93_vm5, %v482_v62, %v484_v35  ;;  %v490_v39 = vsel %vm93_vm5, %v484_v35, %v486_v59 }
 0x235   :  { %644 = vmatprep.subr.mxu0 %v490_v39  ;;  %798 = vmatpush3.msra.mxu1 %v474_v37 }
 0x236   :  { %645 = vmatpush1.msra.mxu0 %v489_v38  ;;  %799 = vmatprep.subr.mxu1 %v825_v5 }
 0x237   :  { %v467_v40 = vpop.permute.xlu1 %466 }
 0x238   :  { %v472_v41 = vsel %vm70_vm6, %v465_v4, %v467_v40  ;;  %v473_v42 = vsel %vm70_vm6, %v467_v40, %v1085_v61 }
 0x239   :  { %646 = vmatprep.subr.mxu0 %v473_v42 }
 0x23a   :  { %647 = vmatpush1.msra.mxu0 %v472_v41 }
 0x23b   :  { %v450_v43 = vpop.permute.xlu1 %449 }
 0x23c   :  { %v455_v44 = vsel %vm47_vm7, %v1089_v7, %v450_v43  ;;  %v456_v45 = vsel %vm47_vm7, %v450_v43, %v1087_v63 }
 0x23d   :  { %648 = vmatprep.subr.mxu0 %v456_v45 }
 0x23e   :  { %649 = vmatpush1.msra.mxu0 %v455_v44 }
 0x23f   :  { %650 = vmatprep.subr.mxu0 %v1056_v48  ;;  %v454_v47 = vpop.permute.xlu1 %453 }
 0x240   :  { %v457_v49 = vsel %vm47_vm7, %v1087_v63, %v454_v47  ;;  %651 = vmatpush1.msra.mxu0 %v1019_v3  ;;  %v615_v50 = vpop.permute.xlu0 %614 }
 0x241   :  { %773 = vmatmul.mubr.msk.f32.vlgmr.msra.gmra.mxu0 %vm264_vm8, %v583_v46  ;;  %800 = vmatpush3.msra.mxu1 %v457_v49 }
 0x242   :  { %801 = vmatprep.subr.mxu1 %v825_v5 }
 0x243   :  { %802 = vmatpush3.msra.mxu1 %v1023_v36 }
 0x244   :  { %804 = vmatmul.mubr.msk.f32.vlgmr.msra.gmra.mxu1 %vm264_vm8, %v583_v46 }
 0x301   :  { %v686_v51 = vpop.f32.mrf.mxu0 }
 0x302   :  { %v687_v52 = vadd.f32 %v686_v51, %v615_v50 }
 0x303   :  { %v688_v53 = vpop.f32.mrf.mxu0 }
 0x304   :  { %v761_v48 = vadd.f32 %v687_v52, %v969_v13  ;;  %v689_v54 = vadd.f32 %v688_v53, %v615_v50  ;;  %v757_v55 = vpop.f32.mrf.mxu1 }
 0x305   :  { %v758_v56 = vadd.f32 %v757_v55, %v615_v50 }
 0x306   :  { %764 = vst [vmem:[%s1154_s6] sm:$0xff] %v761_v48  ;;  %v762_v3 = vadd.f32 %v689_v54, %v965_v12  ;;  %v805_v5 = vpop.f32.mrf.mxu1 }
 0x307   :  { %v763_v36 = vadd.f32 %v758_v56, %v976_v21 }
 0x308   :  { %765 = vst [vmem:[%s1154_s6 + $0x8] sm:$0xff] %v762_v3 }
 0x309   :  { %766 = vst [vmem:[%s1154_s6 + $0x10] sm:$0xff] %v763_v36 }

</bundles_post_ra>
